<compile_context>
chip_gen: v7x
topology: tpu7x:2x2x1
jax: 0.10.0
libtpu: 0.0.40
codegen_flags: <defaults>
</compile_context>

<pallas_src>
import functools

import jax
import jax.numpy as jnp
from jax.experimental import pallas as pl
from jax.experimental.pallas import tpu as pltpu

BERT_HIDDEN = 768                       # fixed by 'bert-base-uncased'
DROP_P = 0.1                            # nn.Dropout(0.1)
DROP_THRESH = int(DROP_P * (1 << 24))   # keep iff (hash & 0xFFFFFF) >= thresh


def _round_up(x, m):
    return (x + m - 1) // m * m


def _round_down(x, m):
    return x // m * m


def _vmem_capacity_bytes():
    # Per-TensorCore VMEM: 128 MiB on v5e/v6e, 64 MiB on v7x.
    try:
        return int(pltpu.get_tpu_info().vmem_capacity_bytes)
    except Exception:
        return 64 * 1024 * 1024          # conservative fallback (v7x)


def text_embedder_kernel(seed_ref, tok_ref, w_ref, b_ref, o_ref, *, apply_dropout):
    """seed: SMEM (1,) i32; tok: (tm,T,H); w: (H,Dp) f32; b: (1,Dp) f32; o: (tm,Dp) f32."""
    tm, T, H = tok_ref.shape

    tok = tok_ref[...]                                          # stay in stored dtype (bf16/f32)

    # torch.FloatTensor(x[1:-1]).mean(axis=0): mean over interior tokens.
    # Sum the full (layout-aligned) tile with f32 accumulation and subtract the
    # two endpoint rows instead of slicing 1:T-1 across the sublane boundary.
    total = jnp.sum(tok, axis=1, dtype=jnp.float32)             # (tm, H) f32
    mean_emb = (total
                - tok[:, 0, :].astype(jnp.float32)
                - tok[:, T - 1, :].astype(jnp.float32)) * (1.0 / (T - 2))

    # fc: Linear(768, embedding_dim) -> MXU matmul + bias, f32 accumulate.
    y = jnp.dot(mean_emb, w_ref[...],
                preferred_element_type=jnp.float32) + b_ref[...]   # (tm, Dp)

    if not apply_dropout:                      # nn.Dropout is identity in eval mode
        o_ref[...] = y.astype(o_ref.dtype)
        return

    # Dropout(p=0.1), training mode. Counter-based lowbias32 hash keyed by
    # (seed, grid tile, element index): deterministic, distinct per tile.
    # The per-tile offset rides the scalar unit; vector work is row*Dp+col+off.
    # TODO(synk): pltpu.prng_seed/prng_random_bits would use the HW PRNG, but the
    # portable integer hash keeps interpret-mode / CPU testing working.
    Dp = y.shape[1]
    row = jax.lax.broadcasted_iota(jnp.int32, y.shape, 0).astype(jnp.uint32)
    col = jax.lax.broadcasted_iota(jnp.int32, y.shape, 1).astype(jnp.uint32)
    off = (pl.program_id(0) * (tm * Dp)).astype(jnp.uint32)        # scalar-unit
    seed = seed_ref[0].astype(jnp.uint32)

    x = row * jnp.uint32(Dp) + col + off                           # unique element id
    x = x ^ (seed * jnp.uint32(0x9E3779B9))
    x = x ^ (x >> 16)
    x = x * jnp.uint32(0x7FEB352D)
    x = x ^ (x >> 15)
    x = x * jnp.uint32(0x846CA68B)
    x = x ^ (x >> 16)
    keep = (x & jnp.uint32(0xFFFFFF)) >= jnp.uint32(DROP_THRESH)

    o_ref[...] = jnp.where(keep, y * (1.0 / (1.0 - DROP_P)), 0.0).astype(o_ref.dtype)


@functools.partial(jax.jit,
                   static_argnames=("embedding_dim", "block_rows", "training"))
def text_embedder_forward(seed, token_embeddings, fc_w, fc_b, *,
                          embedding_dim, block_rows=512, training=True):
    B, T, H = token_embeddings.shape
    D = embedding_dim
    assert H == BERT_HIDDEN and fc_w.shape == (H, D) and T > 2

    # Lane-dense output columns: multiple of 128 (256 when D > 128: the v6e/v7x
    # MXU is 256 columns wide).  Pad is sliced off before returning.
    Dp = _round_up(D, 128) if D <= 128 else _round_up(D, 256)
    fc_b = fc_b.reshape(1, -1)
    if Dp != D:
        fc_w = jnp.pad(fc_w, ((0, 0), (0, Dp - D)))
        fc_b = jnp.pad(fc_b, ((0, 0), (0, Dp - D)))

    # Batch tile: derive from T, dtype and this generation's VMEM capacity so
    # double-buffered token tiles + resident weights + output tiles always fit.
    # Also cap so the grid has >=4 steps when B allows (2 TCs on v7x).
    tok_bytes = token_embeddings.dtype.itemsize
    budget = int(_vmem_capacity_bytes() * 0.70)
    fixed = 2 * (H * Dp + Dp) * 4                    # double-buffered fc weight + bias
    per_row = 2 * T * H * tok_bytes + 2 * Dp * 4     # token + output tiles per batch row
    tm_vmem = max(8, _round_down(max(budget - fixed, 0) // per_row, 8))
    tm_mc = max(8, _round_up(-(-B // 4), 8))         # aim for >=4 grid steps
    tm = max(8, min(block_rows, tm_vmem, tm_mc))

    # No jnp.pad of the batch axis (that would be a full extra HBM pass over the
    # dominant tensor): the last partial block uses Pallas OOB semantics.
    grid = (pl.cdiv(B, tm),)
    vmem_limit = max(32 * 1024 * 1024,
                     min(budget, fixed + tm * per_row + (4 << 20)))

    cost = pl.CostEstimate(
        flops=2 * B * H * Dp + B * T * H,
        transcendentals=0,
        bytes_accessed=B * T * H * tok_bytes + H * Dp * 4 + Dp * 4 + B * Dp * 4,
    )

    grid_spec = pl.GridSpec(
        grid=grid,
        in_specs=[
            pl.BlockSpec(memory_space=pltpu.MemorySpace.SMEM),      # seed (1,) i32
            pl.BlockSpec((tm, T, H), lambda i: (i, 0, 0)),          # token embeddings (streamed)
            pl.BlockSpec((H, Dp), lambda i: (0, 0)),                # fc weight (VMEM-resident)
            pl.BlockSpec((1, Dp), lambda i: (0, 0)),                # fc bias   (VMEM-resident)
        ],
        out_specs=pl.BlockSpec((tm, Dp), lambda i: (i, 0)),
    )

    out = pl.pallas_call(
        functools.partial(text_embedder_kernel, apply_dropout=training),
        out_shape=jax.ShapeDtypeStruct((B, Dp), jnp.float32),
        grid_spec=grid_spec,
        compiler_params=pltpu.CompilerParams(
            dimension_semantics=("parallel",),
            vmem_limit_bytes=int(vmem_limit)),
        cost_estimate=cost,
    )(seed, token_embeddings, fc_w, fc_b)

    return out[:, :D]


if __name__ == "__main__":
    # Small deterministic shapes: batch=8 descriptions, T=8 BERT tokens each
    # (incl. [CLS]/[SEP]), bert hidden=768, embedding_dim=64.
    B, T, D = 8, 8, 64
    key = jax.random.PRNGKey(0)
    k_tok, k_w, k_b = jax.random.split(key, 3)

    # TODO(synk): the HF 'feature-extraction' BERT pipeline and the id->string
    # dictionary lookups have no Pallas equivalent; synthetic bf16 token
    # embeddings stand in for the pipeline output.
    token_embeddings = jax.random.normal(
        k_tok, (B, T, BERT_HIDDEN), jnp.float32).astype(jnp.bfloat16)

    # nn.Linear(768, embedding_dim) parameters (deterministic init).
    bound = 1.0 / float(BERT_HIDDEN) ** 0.5
    fc_w = jax.random.uniform(k_w, (BERT_HIDDEN, D), jnp.float32, -bound, bound)
    fc_b = jax.random.uniform(k_b, (1, D), jnp.float32, -bound, bound)

    seed = jnp.array([1234], dtype=jnp.int32)

    out = text_embedder_forward(seed, token_embeddings, fc_w, fc_b,
                                embedding_dim=D)
    out = jax.block_until_ready(out)
    assert out.shape == (B, D)

    # Reference (pre-dropout): same bf16 token stream, f32 math.
    tok_f32 = token_embeddings.astype(jnp.float32)
    ref = jnp.mean(tok_f32[:, 1:-1, :], axis=1) @ fc_w + fc_b

    # Training mode: surviving entries equal ref / (1-p), dropped are exactly 0.
    kept = out != 0.0
    diff = jnp.where(kept, out * (1.0 - DROP_P) - ref, 0.0)
    assert float(jnp.max(jnp.abs(diff))) < 2e-3
    drop_frac = 1.0 - float(jnp.mean(kept.astype(jnp.float32)))
    assert 0.0 < drop_frac < 0.3   # ~10% expected

    # Eval mode: dropout is an identity.
    out_eval = jax.block_until_ready(
        text_embedder_forward(seed, token_embeddings, fc_w, fc_b,
                              embedding_dim=D, training=False))
    assert float(jnp.max(jnp.abs(out_eval - ref))) < 2e-3

    print("KERNEL_OK")
</pallas_src>

<mosaic_0001>
module attributes {stable_mosaic.version = 11 : i64} {
  func.func @text_embedder_kernel(%arg0: i32, %arg1: memref<1xi32, #tpu.memory_space<smem>>, %arg2: memref<8x8x768xbf16, #tpu.memory_space<vmem>>, %arg3: memref<768x128xf32, #tpu.memory_space<vmem>>, %arg4: memref<1x128xf32, #tpu.memory_space<vmem>>, %arg5: memref<8x128xf32, #tpu.memory_space<vmem>>) attributes {dimension_semantics = [#tpu.dimension_semantics<parallel>], iteration_bounds = array<i64: 1>, scalar_prefetch = 0 : i64, scratch_operands = 0 : i64, tpu.core_type = #tpu.core_type<tc>, window_params = [{transform_indices = @transform_0, window_bounds = array<i64: 1>}, {transform_indices = @transform_1, window_bounds = array<i64: 8, 8, 768>}, {pipeline_mode = #tpu.pipeline_mode<synchronous>, transform_indices = @transform_2, window_bounds = array<i64: 768, 128>}, {pipeline_mode = #tpu.pipeline_mode<synchronous>, transform_indices = @transform_3, window_bounds = array<i64: 1, 128>}, {transform_indices = @transform_4, window_bounds = array<i64: 8, 128>}]} {
    %c0 = arith.constant 0 : index
    %c0_0 = arith.constant 0 : index
    %c0_1 = arith.constant 0 : index
    %0 = vector.load %arg2[%c0, %c0_0, %c0_1] : memref<8x8x768xbf16, #tpu.memory_space<vmem>>, vector<8x8x768xbf16>
    %1 = arith.extf %0 : vector<8x8x768xbf16> to vector<8x8x768xf32>
    %cst = arith.constant dense<0.000000e+00> : vector<8x768xf32>
    %2 = vector.multi_reduction <add>, %1, %cst [1] : vector<8x8x768xf32> to vector<8x768xf32>
    %3 = vector.extract_strided_slice %0 {offsets = [0, 0, 0], sizes = [8, 1, 768], strides = [1, 1, 1]} : vector<8x8x768xbf16> to vector<8x1x768xbf16>
    %4 = vector.shape_cast %3 : vector<8x1x768xbf16> to vector<8x768xbf16>
    %5 = arith.extf %4 : vector<8x768xbf16> to vector<8x768xf32>
    %6 = arith.subf %2, %5 : vector<8x768xf32>
    %7 = vector.extract_strided_slice %0 {offsets = [0, 7, 0], sizes = [8, 1, 768], strides = [1, 1, 1]} : vector<8x8x768xbf16> to vector<8x1x768xbf16>
    %8 = vector.shape_cast %7 : vector<8x1x768xbf16> to vector<8x768xbf16>
    %9 = arith.extf %8 : vector<8x768xbf16> to vector<8x768xf32>
    %10 = arith.subf %6, %9 : vector<8x768xf32>
    %cst_2 = arith.constant 0.166666672 : f32
    %11 = vector.broadcast %cst_2 : f32 to vector<8x768xf32>
    %12 = arith.mulf %10, %11 : vector<8x768xf32>
    %c0_3 = arith.constant 0 : index
    %c0_4 = arith.constant 0 : index
    %13 = vector.load %arg3[%c0_3, %c0_4] : memref<768x128xf32, #tpu.memory_space<vmem>>, vector<768x128xf32>
    %cst_5 = arith.constant dense<0.000000e+00> : vector<8x128xf32>
    %14 = tpu.matmul %12, %13, %cst_5 {dimension_numbers = #tpu.dot_dimension_numbers<[1], [0], [0], [1], [0, 0, 1, 1], [], []>} : vector<8x768xf32>, vector<768x128xf32>, vector<8x128xf32> -> vector<8x128xf32>
    %c0_6 = arith.constant 0 : index
    %c0_7 = arith.constant 0 : index
    %15 = vector.load %arg4[%c0_6, %c0_7] : memref<1x128xf32, #tpu.memory_space<vmem>>, vector<1x128xf32>
    %16 = vector.broadcast %15 : vector<1x128xf32> to vector<8x128xf32>
    %17 = arith.addf %14, %16 : vector<8x128xf32>
    %18 = tpu.iota {dimensions = array<i32: 0>} : vector<8x128xi32>
    %19 = tpu.iota {dimensions = array<i32: 1>} : vector<8x128xi32>
    %c1024_i32 = arith.constant 1024 : i32
    %20 = arith.muli %arg0, %c1024_i32 : i32
    %c0_8 = arith.constant 0 : index
    %21 = memref.load %arg1[%c0_8] : memref<1xi32, #tpu.memory_space<smem>>
    %c128_i32 = arith.constant 128 : i32
    %22 = vector.broadcast %c128_i32 : i32 to vector<8x128xi32>
    %23 = arith.muli %18, %22 : vector<8x128xi32>
    %24 = arith.addi %23, %19 : vector<8x128xi32>
    %25 = vector.broadcast %20 : i32 to vector<8x128xi32>
    %26 = arith.addi %24, %25 : vector<8x128xi32>
    %c-1640531527_i32 = arith.constant -1640531527 : i32
    %27 = arith.muli %21, %c-1640531527_i32 : i32
    %28 = vector.broadcast %27 : i32 to vector<8x128xi32>
    %29 = arith.xori %26, %28 : vector<8x128xi32>
    %c16_i32 = arith.constant 16 : i32
    %30 = vector.broadcast %c16_i32 : i32 to vector<8x128xi32>
    %31 = arith.shrui %29, %30 : vector<8x128xi32>
    %32 = arith.xori %29, %31 : vector<8x128xi32>
    %c2146121005_i32 = arith.constant 2146121005 : i32
    %33 = vector.broadcast %c2146121005_i32 : i32 to vector<8x128xi32>
    %34 = arith.muli %32, %33 : vector<8x128xi32>
    %c15_i32 = arith.constant 15 : i32
    %35 = vector.broadcast %c15_i32 : i32 to vector<8x128xi32>
    %36 = arith.shrui %34, %35 : vector<8x128xi32>
    %37 = arith.xori %34, %36 : vector<8x128xi32>
    %c-2073254261_i32 = arith.constant -2073254261 : i32
    %38 = vector.broadcast %c-2073254261_i32 : i32 to vector<8x128xi32>
    %39 = arith.muli %37, %38 : vector<8x128xi32>
    %c16_i32_9 = arith.constant 16 : i32
    %40 = vector.broadcast %c16_i32_9 : i32 to vector<8x128xi32>
    %41 = arith.shrui %39, %40 : vector<8x128xi32>
    %42 = arith.xori %39, %41 : vector<8x128xi32>
    %c16777215_i32 = arith.constant 16777215 : i32
    %43 = vector.broadcast %c16777215_i32 : i32 to vector<8x128xi32>
    %44 = arith.andi %42, %43 : vector<8x128xi32>
    %c1677721_i32 = arith.constant 1677721 : i32
    %45 = vector.broadcast %c1677721_i32 : i32 to vector<8x128xi32>
    %46 = arith.cmpi uge, %44, %45 : vector<8x128xi32>
    %cst_10 = arith.constant 1.11111116 : f32
    %47 = vector.broadcast %cst_10 : f32 to vector<8x128xf32>
    %48 = arith.mulf %17, %47 : vector<8x128xf32>
    %cst_11 = arith.constant 0.000000e+00 : f32
    %49 = vector.broadcast %cst_11 : f32 to vector<8x128xf32>
    %50 = arith.select %46, %48, %49 : vector<8x128xi1>, vector<8x128xf32>
    %c0_12 = arith.constant 0 : index
    %c0_13 = arith.constant 0 : index
    %51 = vector.load %arg5[%c0_12, %c0_13] : memref<8x128xf32, #tpu.memory_space<vmem>>, vector<8x128xf32>
    tpu.vector_store %arg5[%c0_12, %c0_13], %50 {strides = array<i32>} : memref<8x128xf32, #tpu.memory_space<vmem>>, vector<8x128xf32>,
    return
  }
  func.func @transform_0(%arg0: i32) -> i32 {
    %c0_i32 = arith.constant 0 : i32
    %c0_i32_0 = arith.constant 0 : i32
    return %c0_i32 : i32
  }
  func.func @transform_1(%arg0: i32) -> (i32, i32, i32) {
    %c0_i32 = arith.constant 0 : i32
    %c0_i32_0 = arith.constant 0 : i32
    %c0_i32_1 = arith.constant 0 : i32
    return %arg0, %c0_i32, %c0_i32_0 : i32, i32, i32
  }
  func.func @transform_2(%arg0: i32) -> (i32, i32) {
    %c0_i32 = arith.constant 0 : i32
    %c0_i32_0 = arith.constant 0 : i32
    %c0_i32_1 = arith.constant 0 : i32
    return %c0_i32, %c0_i32_0 : i32, i32
  }
  func.func @transform_3(%arg0: i32) -> (i32, i32) {
    %c0_i32 = arith.constant 0 : i32
    %c0_i32_0 = arith.constant 0 : i32
    %c0_i32_1 = arith.constant 0 : i32
    return %c0_i32, %c0_i32_0 : i32, i32
  }
  func.func @transform_4(%arg0: i32) -> (i32, i32) {
    %c0_i32 = arith.constant 0 : i32
    %c0_i32_0 = arith.constant 0 : i32
    return %arg0, %c0_i32 : i32, i32
  }
}

</mosaic_0001>

<bundles_post_ra>
// kernel: text_embedder_forward.1
= control target key start
LH: loop header
LB: loop body
LE: loop exit
PB: predicated region body
PF: predicated region fallthrough
CT: control target
= control target key end

     0   :  { %vm819_vm0 = vcmask 1041409   ;;  %vm822_vm1 = vcmask 1042434   ;;  %vm825_vm2 = vcmask 1043459   ;;  %vm828_vm3 = vcmask 1044484   ;;  %s2316_s0 = inlined_call_operand.<no memory space> [shape: s32[1], index: 0, kind: input, shape index: {}]   ;;  %s2317_s1 = inlined_call_operand.vmem [shape: bf16[8,8,768], index: 1, kind: input, shape index: {}]   ;;  %s2318_s2 = inlined_call_operand.vmem [shape: f32[768,128], index: 2, kind: input, shape index: {}]   ;;  %s2319_s3 = inlined_call_operand.vmem [shape: f32[1,128], index: 3, kind: input, shape index: {}]   ;;  %s2320_s4 = inlined_call_operand.hbm [shape: f32[8,128], index: 4, kind: output, shape index: {}]  }
   0x1   :  { %v683_v0 = vld [vmem:[%s2318_s2 + $0x80] sm:$0xff]  ;;  %v684_v1 = vld [vmem:[%s2318_s2 + $0x88] sm:$0xff]  ;;  %v685_v11 = vld [vmem:[%s2318_s2 + $0x90] sm:$0xff]  ;;  %vm831_vm4 = vcmask 1045509   ;;  %vm834_vm5 = vcmask 1046534  }
   0x2   :  { %v667_v2 = vld [vmem:[%s2318_s2] sm:$0xff]  ;;  %v1271_v3 = vpack.c.bf16 %v684_v1, %v683_v0  ;;  %v668_v4 = vld [vmem:[%s2318_s2 + $0x8] sm:$0xff]  ;;  %v686_v13 = vld [vmem:[%s2318_s2 + $0x98] sm:$0xff] }
   0x3   :  { %v715_v5 = vld [vmem:[%s2318_s2 + $0x180] sm:$0xff]  ;;  %v716_v6 = vld [vmem:[%s2318_s2 + $0x188] sm:$0xff]  ;;  %v1273_v7 = vpack.c.bf16 %v668_v4, %v667_v2  ;;  %v669_v14 = vld [vmem:[%s2318_s2 + $0x10] sm:$0xff]  ;;  %v1275_v16 = vpack.c.bf16 %v686_v13, %v685_v11 }
   0x4   :  { %v1303_v8 = vpack.c.bf16 %v716_v6, %v715_v5  ;;  %v699_v9 = vld [vmem:[%s2318_s2 + $0x100] sm:$0xff]  ;;  %v700_v10 = vld [vmem:[%s2318_s2 + $0x108] sm:$0xff]  ;;  %1272 = vmatprep.subr.bf16.mxu0 %v1271_v3  ;;  %v670_v15 = vld [vmem:[%s2318_s2 + $0x18] sm:$0xff] }
   0x5   :  { %v1305_v12 = vpack.c.bf16 %v700_v10, %v699_v9  ;;  %1274 = vmatpush3.bf16.msra.mxu0 %v1273_v7  ;;  %v1277_v17 = vpack.c.bf16 %v670_v15, %v669_v14  ;;  %v717_v18 = vld [vmem:[%s2318_s2 + $0x190] sm:$0xff]  ;;  %v718_v19 = vld [vmem:[%s2318_s2 + $0x198] sm:$0xff]  ;;  %v687_v23 = vld [vmem:[%s2318_s2 + $0xa0] sm:$0xff] }
   0x6   :  { %1304 = vmatprep.subr.bf16.mxu1 %v1303_v8  ;;  %v701_v20 = vld [vmem:[%s2318_s2 + $0x110] sm:$0xff]  ;;  %v1307_v21 = vpack.c.bf16 %v718_v19, %v717_v18  ;;  %v702_v22 = vld [vmem:[%s2318_s2 + $0x118] sm:$0xff]  ;;  %v688_v24 = vld [vmem:[%s2318_s2 + $0xa8] sm:$0xff]  ;;  %1276 = vmatprep.subr.bf16.mxu0 %v1275_v16 }
   0x7   :  { %1306 = vmatpush3.bf16.msra.mxu1 %v1305_v12  ;;  %v1309_v25 = vpack.c.bf16 %v702_v22, %v701_v20  ;;  %v1279_v26 = vpack.c.bf16 %v688_v24, %v687_v23  ;;  %v671_v27 = vld [vmem:[%s2318_s2 + $0x20] sm:$0xff]  ;;  %v672_v28 = vld [vmem:[%s2318_s2 + $0x28] sm:$0xff]  ;;  %v689_v35 = vld [vmem:[%s2318_s2 + $0xb0] sm:$0xff] }
   0x8   :  { %v719_v29 = vld [vmem:[%s2318_s2 + $0x1a0] sm:$0xff]  ;;  %1308 = vmatprep.subr.bf16.mxu1 %v1307_v21  ;;  %v720_v30 = vld [vmem:[%s2318_s2 + $0x1a8] sm:$0xff]  ;;  %v1281_v33 = vpack.c.bf16 %v672_v28, %v671_v27  ;;  %v690_v36 = vld [vmem:[%s2318_s2 + $0xb8] sm:$0xff] }
   0x9   :  { %v703_v31 = vld [vmem:[%s2318_s2 + $0x120] sm:$0xff]  ;;  %v704_v32 = vld [vmem:[%s2318_s2 + $0x128] sm:$0xff]  ;;  %1278 = vmatpush3.bf16.msra.mxu0 %v1277_v17  ;;  %v1311_v34 = vpack.c.bf16 %v720_v30, %v719_v29  ;;  %v673_v37 = vld [vmem:[%s2318_s2 + $0x30] sm:$0xff]  ;;  %v1283_v39 = vpack.c.bf16 %v690_v36, %v689_v35 }
   0xa   :  { %1280 = vmatprep.subr.bf16.mxu0 %v1279_v26  ;;  %v1313_v38 = vpack.c.bf16 %v704_v32, %v703_v31  ;;  %v674_v40 = vld [vmem:[%s2318_s2 + $0x38] sm:$0xff]  ;;  %v721_v41 = vld [vmem:[%s2318_s2 + $0x1b0] sm:$0xff]  ;;  %v691_v46 = vld [vmem:[%s2318_s2 + $0xc0] sm:$0xff] }
   0xb   :  { %1310 = vmatpush3.bf16.msra.mxu1 %v1309_v25  ;;  %v722_v42 = vld [vmem:[%s2318_s2 + $0x1b8] sm:$0xff]  ;;  %v705_v44 = vld [vmem:[%s2318_s2 + $0x130] sm:$0xff]  ;;  %v692_v47 = vld [vmem:[%s2318_s2 + $0xc8] sm:$0xff]  ;;  %v1285_v50 = vpack.c.bf16 %v674_v40, %v673_v37 }
   0xc   :  { %1312 = vmatprep.subr.bf16.mxu1 %v1311_v34  ;;  %v1315_v43 = vpack.c.bf16 %v722_v42, %v721_v41  ;;  %v706_v45 = vld [vmem:[%s2318_s2 + $0x138] sm:$0xff]  ;;  %v675_v48 = vld [vmem:[%s2318_s2 + $0x40] sm:$0xff]  ;;  %v676_v49 = vld [vmem:[%s2318_s2 + $0x48] sm:$0xff]  ;;  %v1287_v55 = vpack.c.bf16 %v692_v47, %v691_v46 }
   0xd   :  { %1282 = vmatpush3.bf16.msra.mxu0 %v1281_v33  ;;  %v723_v51 = vld [vmem:[%s2318_s2 + $0x1c0] sm:$0xff]  ;;  %v724_v52 = vld [vmem:[%s2318_s2 + $0x1c8] sm:$0xff]  ;;  %v1317_v54 = vpack.c.bf16 %v706_v45, %v705_v44  ;;  %v693_v57 = vld [vmem:[%s2318_s2 + $0xd0] sm:$0xff]  ;;  %v1289_v2 = vpack.c.bf16 %v676_v49, %v675_v48 }
   0xe   :  { %v707_v53 = vld [vmem:[%s2318_s2 + $0x140] sm:$0xff]  ;;  %1284 = vmatprep.subr.bf16.mxu0 %v1283_v39  ;;  %v708_v56 = vld [vmem:[%s2318_s2 + $0x148] sm:$0xff]  ;;  %v694_v58 = vld [vmem:[%s2318_s2 + $0xd8] sm:$0xff]  ;;  %v1319_v59 = vpack.c.bf16 %v724_v52, %v723_v51 }
   0xf   :  { %1314 = vmatpush3.bf16.msra.mxu1 %v1313_v38  ;;  %v677_v60 = vld [vmem:[%s2318_s2 + $0x50] sm:$0xff]  ;;  %v678_v61 = vld [vmem:[%s2318_s2 + $0x58] sm:$0xff]  ;;  %v695_v3 = vld [vmem:[%s2318_s2 + $0xe0] sm:$0xff]  ;;  %v1321_v6 = vpack.c.bf16 %v708_v56, %v707_v53  ;;  %v1291_v7 = vpack.c.bf16 %v694_v58, %v693_v57 }
  0x10   :  { %1316 = vmatprep.subr.bf16.mxu1 %v1315_v43  ;;  %v725_v62 = vld [vmem:[%s2318_s2 + $0x1d0] sm:$0xff]  ;;  %v726_v63 = vld [vmem:[%s2318_s2 + $0x1d8] sm:$0xff]  ;;  %v696_v4 = vld [vmem:[%s2318_s2 + $0xe8] sm:$0xff]  ;;  %v1293_v15 = vpack.c.bf16 %v678_v61, %v677_v60 }
  0x11   :  { %v709_v0 = vld [vmem:[%s2318_s2 + $0x150] sm:$0xff]  ;;  %v710_v1 = vld [vmem:[%s2318_s2 + $0x158] sm:$0xff]  ;;  %1286 = vmatpush3.bf16.msra.mxu0 %v1285_v50  ;;  %v1571_v5 = vld [vmem:[%s2318_s2 + $0x60] sm:$0xff]  ;;  %v1323_v11 = vpack.c.bf16 %v726_v63, %v725_v62  ;;  %v1295_v17 = vpack.c.bf16 %v696_v4, %v695_v3 }
  0x12   :  { %1288 = vmatprep.subr.bf16.mxu0 %v1287_v55  ;;  %v1576_v8 = vld [vmem:[%s2318_s2 + $0x68] sm:$0xff]  ;;  %v727_v9 = vld [vmem:[%s2318_s2 + $0x1e0] sm:$0xff]  ;;  %v1597_v14 = vld [vmem:[%s2318_s2 + $0xf0] sm:$0xff]  ;;  %v1325_v16 = vpack.c.bf16 %v710_v1, %v709_v0 }
  0x13   :  { %1318 = vmatpush3.bf16.msra.mxu1 %v1317_v54  ;;  %v728_v10 = vld [vmem:[%s2318_s2 + $0x1e8] sm:$0xff]  ;;  %v1587_v12 = vld [vmem:[%s2318_s2 + $0x160] sm:$0xff]  ;;  %v698_v18 = vld [vmem:[%s2318_s2 + $0xf8] sm:$0xff]  ;;  %v1297_v21 = vpack.c.bf16 %v1576_v8, %v1571_v5 }
  0x14   :  { %1320 = vmatprep.subr.bf16.mxu1 %v1319_v59  ;;  %v1592_v13 = vld [vmem:[%s2318_s2 + $0x168] sm:$0xff]  ;;  %v1605_v19 = vld [vmem:[%s2318_s2 + $0x70] sm:$0xff]  ;;  %v1610_v20 = vld [vmem:[%s2318_s2 + $0x78] sm:$0xff]  ;;  %v1327_v22 = vpack.c.bf16 %v728_v10, %v727_v9  ;;  %v1299_v24 = vpack.c.bf16 %v698_v18, %v1597_v14 }
  0x15   :  { %1290 = vmatpush3.bf16.msra.mxu0 %v1289_v2  ;;  %v1329_v23 = vpack.c.bf16 %v1592_v13, %v1587_v12  ;;  %v729_v25 = vld [vmem:[%s2318_s2 + $0x1f0] sm:$0xff]  ;;  %v730_v26 = vld [vmem:[%s2318_s2 + $0x1f8] sm:$0xff]  ;;  %v19_v27 = vld [vmem:[%s2317_s1] sm:$0xff]  ;;  %v1301_v28 = vpack.c.bf16 %v1610_v20, %v1605_v19 }
  0x16   :  { %1292 = vmatprep.subr.bf16.mxu0 %v1291_v7  ;;  %v1331_v29 = vpack.c.bf16 %v730_v26, %v729_v25  ;;  %v22_v30 = vld [vmem:[%s2317_s1 + $0x18] sm:$0xff]  ;;  %v1634_v31 = vld [vmem:[%s2317_s1 + $0x30] sm:$0xff]  ;;  %v1639_v32 = vld [vmem:[%s2317_s1 + $0x48] sm:$0xff]  ;;  %v1641_v33 = vunpack.c.h.bf16 %v19_v27  ;;  %v1643_v34 = vunpack.c.l.bf16 %v19_v27 }
  0x17   :  { %1322 = vmatpush3.bf16.msra.mxu1 %v1321_v6  ;;  %v1648_v35 = vld [vmem:[%s2317_s1 + $0x60] sm:$0xff]  ;;  %v1653_v36 = vld [vmem:[%s2317_s1 + $0x78] sm:$0xff]  ;;  %v1658_v37 = vld [vmem:[%s2317_s1 + $0x90] sm:$0xff]  ;;  %v1660_v38 = vunpack.c.h.bf16 %v22_v30  ;;  %v1663_v39 = vunpack.c.h.bf16 %v1634_v31  ;;  %v1666_v40 = vunpack.c.h.bf16 %v1639_v32  ;;  %v1668_v41 = vunpack.c.l.bf16 %v22_v30 }
  0x18   :  { %1324 = vmatprep.subr.bf16.mxu1 %v1323_v11  ;;  %v1673_v42 = vld [vmem:[%s2317_s1 + $0xa8] sm:$0xff]  ;;  %v1676_v43 = vunpack.c.h.bf16 %v1648_v35  ;;  %v1679_v44 = vunpack.c.h.bf16 %v1653_v36  ;;  %v1682_v45 = vunpack.c.h.bf16 %v1658_v37  ;;  %v97_v46 = vrot.slane %v1641_v33, 4 }
  0x19   :  { %1294 = vmatpush3.bf16.msra.mxu0 %v1293_v15  ;;  %v1686_v47 = vunpack.c.h.bf16 %v1673_v42  ;;  %v133_v48 = vrot.slane %v1660_v38, 4  ;;  %v169_v49 = vrot.slane %v1663_v39, 4  ;;  %v205_v50 = vrot.slane %v1666_v40, 4 }
  0x1a   :  { %1296 = vmatprep.subr.bf16.mxu0 %v1295_v17  ;;  %v98_v51 = vadd.f32 %v97_v46, %v1641_v33  ;;  %v241_v52 = vrot.slane %v1676_v43, 4  ;;  %v277_v53 = vrot.slane %v1679_v44, 4  ;;  %v313_v54 = vrot.slane %v1682_v45, 4 }
  0x1b   :  { %1326 = vmatpush3.bf16.msra.mxu1 %v1325_v16  ;;  %v134_v55 = vadd.f32 %v133_v48, %v1660_v38  ;;  %v170_v56 = vadd.f32 %v169_v49, %v1663_v39  ;;  %v206_v57 = vadd.f32 %v205_v50, %v1666_v40  ;;  %v349_v58 = vrot.slane %v1686_v47, 4 }
  0x1c   :  { %1328 = vmatprep.subr.bf16.mxu1 %v1327_v22  ;;  %v99_v59 = vrot.slane %v98_v51, 2  ;;  %v242_v60 = vadd.f32 %v241_v52, %v1676_v43  ;;  %v278_v61 = vadd.f32 %v277_v53, %v1679_v44  ;;  %v314_v62 = vadd.f32 %v313_v54, %v1682_v45 }
  0x1d   :  { %1298 = vmatpush3.bf16.msra.mxu0 %v1297_v21  ;;  %v135_v63 = vrot.slane %v134_v55, 2  ;;  %v171_v0 = vrot.slane %v170_v56, 2  ;;  %v207_v1 = vrot.slane %v206_v57, 2  ;;  %v350_v2 = vadd.f32 %v349_v58, %v1686_v47 }
  0x1e   :  { %1300 = vmatprep.subr.bf16.mxu0 %v1299_v24  ;;  %v100_v3 = vadd.f32 %v99_v59, %v98_v51  ;;  %v243_v4 = vrot.slane %v242_v60, 2  ;;  %v279_v5 = vrot.slane %v278_v61, 2  ;;  %v315_v6 = vrot.slane %v314_v62, 2 }
  0x1f   :  { %1330 = vmatpush3.bf16.msra.mxu1 %v1329_v23  ;;  %v136_v7 = vadd.f32 %v135_v63, %v134_v55  ;;  %v172_v8 = vadd.f32 %v171_v0, %v170_v56  ;;  %v208_v9 = vadd.f32 %v207_v1, %v206_v57  ;;  %v351_v10 = vrot.slane %v350_v2, 2 }
  0x20   :  { %1332 = vmatprep.subr.bf16.mxu1 %v1331_v29  ;;  %v101_v11 = vrot.slane %v100_v3, 1  ;;  %v244_v12 = vadd.f32 %v243_v4, %v242_v60  ;;  %v280_v13 = vadd.f32 %v279_v5, %v278_v61  ;;  %v316_v14 = vadd.f32 %v315_v6, %v314_v62 }
  0x21   :  { %1302 = vmatpush3.bf16.msra.mxu0 %v1301_v28  ;;  %v137_v15 = vrot.slane %v136_v7, 1  ;;  %v173_v16 = vrot.slane %v172_v8, 1  ;;  %v209_v17 = vrot.slane %v208_v9, 1  ;;  %v352_v18 = vadd.f32 %v351_v10, %v350_v2 }
  0x22   :  { %v102_v19 = vadd.f32 %v101_v11, %v100_v3  ;;  %v245_v20 = vrot.slane %v244_v12, 1  ;;  %v281_v21 = vrot.slane %v280_v13, 1  ;;  %v317_v22 = vrot.slane %v316_v14, 1 }
  0x23   :  { %v138_v23 = vadd.f32 %v137_v15, %v136_v7  ;;  %v174_v24 = vadd.f32 %v173_v16, %v172_v8  ;;  %v210_v25 = vadd.f32 %v209_v17, %v208_v9  ;;  %v353_v26 = vrot.slane %v352_v18, 1 }
  0x24   :  { %v246_v27 = vadd.f32 %v245_v20, %v244_v12  ;;  %v282_v29 = vadd.f32 %v281_v21, %v280_v13  ;;  %v318_v30 = vadd.f32 %v317_v22, %v316_v14  ;;  %v380_v46 = vsub.f32 %v102_v19, %v1641_v33 }
  0x25   :  { %v354_v48 = vadd.f32 %v353_v26, %v352_v18  ;;  %v386_v28 = vsub.f32 %v138_v23, %v1660_v38  ;;  %v392_v49 = vsub.f32 %v174_v24, %v1663_v39  ;;  %v398_v50 = vsub.f32 %v210_v25, %v1666_v40 }
  0x26   :  { %v404_v51 = vsub.f32 %v246_v27, %v1676_v43  ;;  %v410_v52 = vsub.f32 %v282_v29, %v1679_v44  ;;  %v416_v53 = vsub.f32 %v318_v30, %v1682_v45  ;;  %v476_v54 = vrot.slane %v1641_v33, 7  ;;  %v713_v33 = vld [vmem:[%s2318_s2 + $0x170] sm:$0xff] }
  0x27   :  { %v422_v55 = vsub.f32 %v354_v48, %v1686_v47  ;;  %v482_v56 = vrot.slane %v1660_v38, 7  ;;  %v488_v57 = vrot.slane %v1663_v39, 7  ;;  %v494_v58 = vrot.slane %v1666_v40, 7  ;;  %v714_v38 = vld [vmem:[%s2318_s2 + $0x178] sm:$0xff] }
  0x28   :  { %v500_v59 = vrot.slane %v1676_v43, 7  ;;  %v506_v60 = vrot.slane %v1679_v44, 7  ;;  %v512_v61 = vrot.slane %v1682_v45, 7  ;;  %v518_v62 = vrot.slane %v1686_v47, 7 }
  0x29   :  { %v572_v39 = vsub.f32 %v380_v46, %v476_v54  ;;  %v578_v40 = vsub.f32 %v386_v28, %v482_v56  ;;  %v584_v63 = vsub.f32 %v392_v49, %v488_v57  ;;  %v590_v0 = vsub.f32 %v398_v50, %v494_v58 }
  0x2a   :  { %10 = vsyncpa [#allocation4], 0  ;;  %v596_v43 = vsub.f32 %v404_v51, %v500_v59  ;;  %v602_v44 = vsub.f32 %v410_v52, %v506_v60  ;;  %v608_v45 = vsub.f32 %v416_v53, %v512_v61  ;;  %v614_v1 = vsub.f32 %v422_v55, %v518_v62  ;;  %s1135_s23 = smul.u32 2654435769, %s2316_s0 }
  0x2b   :  { %vm837_vm6 = vcmask 1047559   ;;  %v620_v47 = vmul.f32 0.16666667, %v572_v39  ;;  %v626_v2 = vmul.f32 0.16666667, %v578_v40  ;;  %v1333_v4 = vpack.c.bf16 %v714_v38, %v713_v33 }
  0x2c   :  { %v632_v3 = vmul.f32 0.16666667, %v584_v63  ;;  %v638_v5 = vmul.f32 0.16666667, %v590_v0  ;;  %v644_v6 = vmul.f32 0.16666667, %v596_v43  ;;  %v1726_v8 = vunpack.c.l.bf16 %v1634_v31 }
  0x2d   :  { %v650_v7 = vmul.f32 0.16666667, %v602_v44  ;;  %v656_v9 = vmul.f32 0.16666667, %v608_v45  ;;  %v662_v10 = vmul.f32 0.16666667, %v614_v1  ;;  %1334 = vmatpush3.bf16.msra.mxu1 %v1333_v4  ;;  %v1729_v16 = vunpack.c.l.bf16 %v1639_v32 }
  0x2e   :  { %v839_v11 = vrot.slane %v626_v2, 7  ;;  %v841_v12 = vrot.slane %v632_v3, 6  ;;  %v843_v13 = vrot.slane %v638_v5, 5  ;;  %v845_v14 = vrot.slane %v644_v6, 4 }
  0x2f   :  { %v847_v15 = vrot.slane %v650_v7, 3  ;;  %v849_v18 = vrot.slane %v656_v9, 2  ;;  %v851_v19 = vrot.slane %v662_v10, 1  ;;  %v1733_v20 = vunpack.c.l.bf16 %v1648_v35 }
  0x30   :  { %v840_v17 = vsel %vm819_vm0, %v839_v11, %v620_v47  ;;  %v1737_v21 = vunpack.c.l.bf16 %v1653_v36  ;;  %v1740_v22 = vunpack.c.l.bf16 %v1658_v37  ;;  %v1743_v23 = vunpack.c.l.bf16 %v1673_v42 }
  0x31   :  { %v842_v31 = vsel %vm822_vm1, %v841_v12, %v840_v17  ;;  %v91_v24 = vrot.slane %v1643_v34, 4  ;;  %v127_v25 = vrot.slane %v1668_v41, 4  ;;  %v163_v35 = vrot.slane %v1726_v8, 4 }
  0x32   :  { %v844_v32 = vsel %vm825_vm2, %v843_v13, %v842_v31  ;;  %v199_v27 = vrot.slane %v1729_v16, 4  ;;  %v235_v36 = vrot.slane %v1733_v20, 4  ;;  %v271_v37 = vrot.slane %v1737_v21, 4 }
  0x33   :  { %v846_v26 = vsel %vm828_vm3, %v845_v14, %v844_v32  ;;  %v92_v42 = vadd.f32 %v91_v24, %v1643_v34  ;;  %v128_v30 = vadd.f32 %v127_v25, %v1668_v41  ;;  %v164_v46 = vadd.f32 %v163_v35, %v1726_v8 }
  0x34   :  { %v848_v29 = vsel %vm831_vm4, %v847_v15, %v846_v26  ;;  %v200_v28 = vadd.f32 %v199_v27, %v1729_v16  ;;  %v236_v49 = vadd.f32 %v235_v36, %v1733_v20  ;;  %v272_v50 = vadd.f32 %v271_v37, %v1737_v21 }
  0x35   :  { %v850_v48 = vsel %vm834_vm5, %v849_v18, %v848_v29  ;;  %v93_v52 = vrot.slane %v92_v42, 2  ;;  %v129_v53 = vrot.slane %v128_v30, 2  ;;  %v165_v54 = vrot.slane %v164_v46, 2 }
  0x36   :  { %v852_v51 = vsel %vm837_vm6, %v851_v19, %v850_v48  ;;  %v201_v55 = vrot.slane %v200_v28, 2  ;;  %v237_v56 = vrot.slane %v236_v49, 2  ;;  %v273_v57 = vrot.slane %v272_v50, 2 }
  0x37   :  { %979 = vmatprep.mubr.f32.mxu0 %v852_v51  ;;  %v307_v58 = vrot.slane %v1740_v22, 4  ;;  %v94_v59 = vadd.f32 %v93_v52, %v92_v42  ;;  %v130_v60 = vadd.f32 %v129_v53, %v128_v30  ;;  %v166_v61 = vadd.f32 %v165_v54, %v164_v46  ;;  %v1796_v51 = vld [vmem:[%s2317_s1 + $0x20] sm:$0xff]  ;;  %v1801_v52 = vld [vmem:[%s2317_s1 + $0x38] sm:$0xff] }
  0x38   :  { %v343_v62 = vrot.slane %v1743_v23, 4  ;;  %v202_v33 = vadd.f32 %v201_v55, %v200_v28  ;;  %v238_v38 = vadd.f32 %v237_v56, %v236_v49  ;;  %v274_v39 = vadd.f32 %v273_v57, %v272_v50 }
  0x39   :  { %v308_v40 = vadd.f32 %v307_v58, %v1740_v22  ;;  %v95_v63 = vrot.slane %v94_v59, 1  ;;  %v131_v0 = vrot.slane %v130_v60, 1  ;;  %v167_v43 = vrot.slane %v166_v61, 1 }
  0x3a   :  { %v344_v44 = vadd.f32 %v343_v62, %v1743_v23  ;;  %v203_v45 = vrot.slane %v202_v33, 1  ;;  %v239_v1 = vrot.slane %v238_v38, 1  ;;  %v275_v47 = vrot.slane %v274_v39, 1 }
  0x3b   :  { %v309_v2 = vrot.slane %v308_v40, 2  ;;  %v96_v3 = vadd.f32 %v95_v63, %v94_v59  ;;  %v132_v4 = vadd.f32 %v131_v0, %v130_v60  ;;  %v168_v5 = vadd.f32 %v167_v43, %v166_v61  ;;  %v1806_v60 = vld [vmem:[%s2317_s1 + $0x50] sm:$0xff]  ;;  %v1811_v61 = vld [vmem:[%s2317_s1 + $0x68] sm:$0xff] }
  0x3c   :  { %v345_v6 = vrot.slane %v344_v44, 2  ;;  %v204_v7 = vadd.f32 %v203_v45, %v202_v33  ;;  %v240_v9 = vadd.f32 %v239_v1, %v238_v38  ;;  %v276_v10 = vadd.f32 %v275_v47, %v274_v39  ;;  %v1826_v45 = vld [vmem:[%s2317_s1 + $0xb0] sm:$0xff] }
  0x3d   :  { %v310_v11 = vadd.f32 %v309_v2, %v308_v40  ;;  %v379_v13 = vsub.f32 %v96_v3, %v1643_v34  ;;  %v385_v14 = vsub.f32 %v132_v4, %v1668_v41  ;;  %v391_v15 = vsub.f32 %v168_v5, %v1726_v8  ;;  %v1816_v40 = vld [vmem:[%s2317_s1 + $0x80] sm:$0xff] }
  0x3e   :  { %v346_v12 = vadd.f32 %v345_v6, %v344_v44  ;;  %v397_v18 = vsub.f32 %v204_v7, %v1729_v16  ;;  %v403_v19 = vsub.f32 %v240_v9, %v1733_v20  ;;  %v409_v31 = vsub.f32 %v276_v10, %v1737_v21  ;;  %v1821_v44 = vld [vmem:[%s2317_s1 + $0x98] sm:$0xff] }
  0x3f   :  { %v311_v17 = vrot.slane %v310_v11, 1  ;;  %v475_v24 = vrot.slane %v1643_v34, 7  ;;  %v481_v25 = vrot.slane %v1668_v41, 7  ;;  %v487_v35 = vrot.slane %v1726_v8, 7  ;;  %v747_v8 = vld [vmem:[%s2318_s2 + $0x280] sm:$0xff] }
  0x40   :  { %v347_v32 = vrot.slane %v346_v12, 1  ;;  %v493_v27 = vrot.slane %v1729_v16, 7  ;;  %v499_v36 = vrot.slane %v1733_v20, 7  ;;  %v505_v37 = vrot.slane %v1737_v21, 7  ;;  %v748_v16 = vld [vmem:[%s2318_s2 + $0x288] sm:$0xff] }
  0x41   :  { %v312_v26 = vadd.f32 %v311_v17, %v310_v11  ;;  %v511_v42 = vrot.slane %v1740_v22, 7  ;;  %v517_v30 = vrot.slane %v1743_v23, 7  ;;  %v571_v46 = vsub.f32 %v379_v13, %v475_v24 }
  0x42   :  { %v348_v29 = vadd.f32 %v347_v32, %v346_v12  ;;  %v577_v34 = vsub.f32 %v385_v14, %v481_v25  ;;  %v583_v28 = vsub.f32 %v391_v15, %v487_v35  ;;  %v589_v41 = vsub.f32 %v397_v18, %v493_v27 }
  0x43   :  { %v415_v48 = vsub.f32 %v312_v26, %v1740_v22  ;;  %v595_v21 = vsub.f32 %v403_v19, %v499_v36  ;;  %v601_v49 = vsub.f32 %v409_v31, %v505_v37  ;;  %v619_v50 = vmul.f32 0.16666667, %v571_v46  ;;  %v1791_v22 = vld [vmem:[%s2317_s1 + $0x8] sm:$0xff] }
  0x44   :  { %v421_v20 = vsub.f32 %v348_v29, %v1743_v23  ;;  %v625_v23 = vmul.f32 0.16666667, %v577_v34  ;;  %v631_v54 = vmul.f32 0.16666667, %v583_v28  ;;  %v637_v55 = vmul.f32 0.16666667, %v589_v41 }
  0x45   :  { %v607_v53 = vsub.f32 %v415_v48, %v511_v42  ;;  %v643_v57 = vmul.f32 0.16666667, %v595_v21  ;;  %v649_v58 = vmul.f32 0.16666667, %v601_v49  ;;  %v1335_v59 = vpack.c.bf16 %v748_v16, %v747_v8 }
  0x46   :  { %v613_v56 = vsub.f32 %v421_v20, %v517_v30  ;;  %v818_v33 = vrot.slane %v625_v23, 7  ;;  %v821_v38 = vrot.slane %v631_v54, 6  ;;  %v824_v39 = vrot.slane %v637_v55, 5 }
  0x47   :  { %v655_v62 = vmul.f32 0.16666667, %v607_v53  ;;  %v827_v0 = vrot.slane %v643_v57, 4  ;;  %v830_v43 = vrot.slane %v649_v58, 3  ;;  %1336 = vmatprep.subr.bf16.mxu0 %v1335_v59  ;;  %v1829_v1 = vunpack.c.h.bf16 %v1791_v22 }
  0x48   :  { %v661_v63 = vmul.f32 0.16666667, %v613_v56  ;;  %v820_v47 = vsel %vm819_vm0, %v818_v33, %v619_v50  ;;  %v1833_v3 = vunpack.c.h.bf16 %v1796_v51  ;;  %v1836_v4 = vunpack.c.h.bf16 %v1801_v52 }
  0x49   :  { %v833_v2 = vrot.slane %v655_v62, 2  ;;  %v823_v5 = vsel %vm822_vm1, %v821_v38, %v820_v47  ;;  %v1840_v7 = vunpack.c.h.bf16 %v1806_v60  ;;  %v1843_v9 = vunpack.c.h.bf16 %v1811_v61 }
  0x4a   :  { %v836_v6 = vrot.slane %v661_v63, 1  ;;  %v826_v10 = vsel %vm825_vm2, %v824_v39, %v823_v5  ;;  %v1847_v11 = vunpack.c.h.bf16 %v1816_v40  ;;  %v1850_v12 = vunpack.c.h.bf16 %v1821_v44 }
  0x4b   :  { %v1853_v13 = vunpack.c.h.bf16 %v1826_v45  ;;  %v829_v14 = vsel %vm828_vm3, %v827_v0, %v826_v10  ;;  %v109_v15 = vrot.slane %v1829_v1, 4  ;;  %v145_v17 = vrot.slane %v1833_v3, 4 }
  0x4c   :  { %v181_v18 = vrot.slane %v1836_v4, 4  ;;  %v832_v19 = vsel %vm831_vm4, %v830_v43, %v829_v14  ;;  %v217_v31 = vrot.slane %v1840_v7, 4  ;;  %v253_v32 = vrot.slane %v1843_v9, 4 }
  0x4d   :  { %v289_v24 = vrot.slane %v1847_v11, 4  ;;  %v835_v25 = vsel %vm834_vm5, %v833_v2, %v832_v19  ;;  %v110_v35 = vadd.f32 %v109_v15, %v1829_v1  ;;  %v146_v26 = vadd.f32 %v145_v17, %v1833_v3 }
  0x4e   :  { %v182_v27 = vadd.f32 %v181_v18, %v1836_v4  ;;  %v838_v36 = vsel %vm837_vm6, %v836_v6, %v835_v25  ;;  %v218_v37 = vadd.f32 %v217_v31, %v1840_v7  ;;  %v254_v29 = vadd.f32 %v253_v32, %v1843_v9 }
  0x4f   :  { %v290_v42 = vadd.f32 %v289_v24, %v1847_v11  ;;  %980 = vmatmul.mubr.f32.vlgmr.msra.gmra.mrb[0].mxu0 %v838_v36  ;;  %v111_v30 = vrot.slane %v110_v35, 2  ;;  %v147_v46 = vrot.slane %v146_v26, 2  ;;  %v325_v34 = vrot.slane %v1850_v12, 4 }
  0x50   :  { %v183_v48 = vrot.slane %v182_v27, 2  ;;  %v219_v28 = vrot.slane %v218_v37, 2  ;;  %v255_v41 = vrot.slane %v254_v29, 2  ;;  %v361_v16 = vrot.slane %v1853_v13, 4 }
  0x51   :  { %v291_v8 = vrot.slane %v290_v42, 2  ;;  %v112_v20 = vadd.f32 %v111_v30, %v110_v35  ;;  %v148_v21 = vadd.f32 %v147_v46, %v146_v26  ;;  %v326_v50 = vadd.f32 %v325_v34, %v1850_v12 }
  0x52   :  { %v184_v49 = vadd.f32 %v183_v48, %v182_v27  ;;  %v220_v53 = vadd.f32 %v219_v28, %v218_v37  ;;  %v256_v23 = vadd.f32 %v255_v41, %v254_v29  ;;  %v362_v55 = vadd.f32 %v361_v16, %v1853_v13 }
  0x53   :  { %v292_v54 = vadd.f32 %v291_v8, %v290_v42  ;;  %v113_v56 = vrot.slane %v112_v20, 1  ;;  %v149_v57 = vrot.slane %v148_v21, 1  ;;  %v327_v59 = vrot.slane %v326_v50, 2 }
  0x54   :  { %v185_v58 = vrot.slane %v184_v49, 1  ;;  %v221_v62 = vrot.slane %v220_v53, 1  ;;  %v257_v33 = vrot.slane %v256_v23, 1  ;;  %v363_v39 = vrot.slane %v362_v55, 2 }
  0x55   :  { %v293_v38 = vrot.slane %v292_v54, 1  ;;  %v114_v63 = vadd.f32 %v113_v56, %v112_v20  ;;  %v150_v0 = vadd.f32 %v149_v57, %v148_v21  ;;  %v328_v47 = vadd.f32 %v327_v59, %v326_v50 }
  0x56   :  { %v186_v43 = vadd.f32 %v185_v58, %v184_v49  ;;  %v222_v2 = vadd.f32 %v221_v62, %v220_v53  ;;  %v258_v5 = vadd.f32 %v257_v33, %v256_v23  ;;  %v364_v10 = vadd.f32 %v363_v39, %v362_v55 }
  0x57   :  { %v294_v6 = vadd.f32 %v293_v38, %v292_v54  ;;  %v329_v14 = vrot.slane %v328_v47, 1  ;;  %v382_v15 = vsub.f32 %v114_v63, %v1829_v1  ;;  %v388_v17 = vsub.f32 %v150_v0, %v1833_v3 }
  0x58   :  { %v394_v18 = vsub.f32 %v186_v43, %v1836_v4  ;;  %v365_v19 = vrot.slane %v364_v10, 1  ;;  %v400_v31 = vsub.f32 %v222_v2, %v1840_v7  ;;  %v406_v32 = vsub.f32 %v258_v5, %v1843_v9 }
  0x59   :  { %v412_v24 = vsub.f32 %v294_v6, %v1847_v11  ;;  %v330_v25 = vadd.f32 %v329_v14, %v328_v47  ;;  %v478_v35 = vrot.slane %v1829_v1, 7  ;;  %v484_v26 = vrot.slane %v1833_v3, 7 }
  0x5a   :  { %v490_v27 = vrot.slane %v1836_v4, 7  ;;  %v366_v36 = vadd.f32 %v365_v19, %v364_v10  ;;  %v496_v37 = vrot.slane %v1840_v7, 7  ;;  %v502_v29 = vrot.slane %v1843_v9, 7  ;;  %v731_v4 = vld [vmem:[%s2318_s2 + $0x200] sm:$0xff]  ;;  %v732_v7 = vld [vmem:[%s2318_s2 + $0x208] sm:$0xff] }
  0x5b   :  { %v508_v42 = vrot.slane %v1847_v11, 7  ;;  %v418_v30 = vsub.f32 %v330_v25, %v1850_v12  ;;  %v514_v46 = vrot.slane %v1850_v12, 7  ;;  %v520_v48 = vrot.slane %v1853_v13, 7 }
  0x5c   :  { %v574_v34 = vsub.f32 %v382_v15, %v478_v35  ;;  %v424_v1 = vsub.f32 %v366_v36, %v1853_v13  ;;  %v580_v28 = vsub.f32 %v388_v17, %v484_v26  ;;  %v586_v3 = vsub.f32 %v394_v18, %v490_v27 }
  0x5d   :  { %v592_v41 = vsub.f32 %v400_v31, %v496_v37  ;;  %v598_v9 = vsub.f32 %v406_v32, %v502_v29  ;;  %v604_v11 = vsub.f32 %v412_v24, %v508_v42  ;;  %v610_v8 = vsub.f32 %v418_v30, %v514_v46 }
  0x5e   :  { %v622_v12 = vmul.f32 0.16666667, %v574_v34  ;;  %v616_v16 = vsub.f32 %v424_v1, %v520_v48  ;;  %v628_v20 = vmul.f32 0.16666667, %v580_v28  ;;  %v634_v21 = vmul.f32 0.16666667, %v586_v3 }
  0x5f   :  { %v640_v49 = vmul.f32 0.16666667, %v592_v41  ;;  %v646_v13 = vmul.f32 0.16666667, %v598_v9  ;;  %v652_v50 = vmul.f32 0.16666667, %v604_v11  ;;  %v1337_v23 = vpack.c.bf16 %v732_v7, %v731_v4 }
  0x60   :  { %v658_v53 = vmul.f32 0.16666667, %v610_v8  ;;  %v664_v54 = vmul.f32 0.16666667, %v616_v16  ;;  %v867_v55 = vrot.slane %v628_v20, 7  ;;  %v869_v56 = vrot.slane %v634_v21, 6 }
  0x61   :  { %v871_v57 = vrot.slane %v640_v49, 5  ;;  %v873_v58 = vrot.slane %v646_v13, 4  ;;  %v875_v59 = vrot.slane %v652_v50, 3  ;;  %1338 = vmatpush3.bf16.msra.mxu0 %v1337_v23  ;;  %v1898_v33 = vunpack.c.l.bf16 %v1791_v22 }
  0x62   :  { %v877_v62 = vrot.slane %v658_v53, 2  ;;  %v868_v38 = vsel %vm819_vm0, %v867_v55, %v622_v12  ;;  %v879_v39 = vrot.slane %v664_v54, 1  ;;  %v1902_v63 = vunpack.c.l.bf16 %v1796_v51 }
  0x63   :  { %v1905_v0 = vunpack.c.l.bf16 %v1801_v52  ;;  %v870_v43 = vsel %vm822_vm1, %v869_v56, %v868_v38  ;;  %v1909_v47 = vunpack.c.l.bf16 %v1806_v60  ;;  %v1912_v2 = vunpack.c.l.bf16 %v1811_v61 }
  0x64   :  { %v1915_v22 = vunpack.c.l.bf16 %v1816_v40  ;;  %v872_v5 = vsel %vm825_vm2, %v871_v57, %v870_v43  ;;  %v1919_v6 = vunpack.c.l.bf16 %v1821_v44  ;;  %v1922_v51 = vunpack.c.l.bf16 %v1826_v45 }
  0x65   :  { %v103_v52 = vrot.slane %v1898_v33, 4  ;;  %v874_v10 = vsel %vm828_vm3, %v873_v58, %v872_v5  ;;  %v139_v60 = vrot.slane %v1902_v63, 4  ;;  %v175_v61 = vrot.slane %v1905_v0, 4 }
  0x66   :  { %v211_v14 = vrot.slane %v1909_v47, 4  ;;  %v876_v40 = vsel %vm831_vm4, %v875_v59, %v874_v10  ;;  %v247_v44 = vrot.slane %v1912_v2, 4  ;;  %v283_v17 = vrot.slane %v1915_v22, 4 }
  0x67   :  { %v104_v15 = vadd.f32 %v103_v52, %v1898_v33  ;;  %v878_v45 = vsel %vm834_vm5, %v877_v62, %v876_v40  ;;  %v140_v18 = vadd.f32 %v139_v60, %v1902_v63  ;;  %v176_v19 = vadd.f32 %v175_v61, %v1905_v0 }
  0x68   :  { %v212_v31 = vadd.f32 %v211_v14, %v1909_v47  ;;  %v880_v32 = vsel %vm837_vm6, %v879_v39, %v878_v45  ;;  %v248_v25 = vadd.f32 %v247_v44, %v1912_v2  ;;  %v284_v35 = vadd.f32 %v283_v17, %v1915_v22 }
  0x69   :  { %v105_v24 = vrot.slane %v104_v15, 2  ;;  %1049 = vmatprep.mubr.f32.mxu1 %v880_v32  ;;  %v141_v26 = vrot.slane %v140_v18, 2  ;;  %v177_v27 = vrot.slane %v176_v19, 2  ;;  %v319_v37 = vrot.slane %v1919_v6, 4 }
  0x6a   :  { %v213_v36 = vrot.slane %v212_v31, 2  ;;  %v249_v42 = vrot.slane %v248_v25, 2  ;;  %v285_v30 = vrot.slane %v284_v35, 2  ;;  %v355_v46 = vrot.slane %v1922_v51, 4 }
  0x6b   :  { %v106_v29 = vadd.f32 %v105_v24, %v104_v15  ;;  %v142_v48 = vadd.f32 %v141_v26, %v140_v18  ;;  %v178_v34 = vadd.f32 %v177_v27, %v176_v19  ;;  %v320_v28 = vadd.f32 %v319_v37, %v1919_v6  ;;  %v752_v27 = vld [vmem:[%s2318_s2 + $0x2a8] sm:$0xff] }
  0x6c   :  { %v214_v1 = vadd.f32 %v213_v36, %v212_v31  ;;  %v250_v41 = vadd.f32 %v249_v42, %v248_v25  ;;  %v286_v4 = vadd.f32 %v285_v30, %v284_v35  ;;  %v356_v7 = vadd.f32 %v355_v46, %v1922_v51  ;;  %v1981_v36 = vld [vmem:[%s2318_s2 + $0x220] sm:$0xff]  ;;  %v1986_v37 = vld [vmem:[%s2318_s2 + $0x228] sm:$0xff] }
  0x6d   :  { %v107_v3 = vrot.slane %v106_v29, 1  ;;  %v143_v9 = vrot.slane %v142_v48, 1  ;;  %v179_v11 = vrot.slane %v178_v34, 1  ;;  %v321_v12 = vrot.slane %v320_v28, 2 }
  0x6e   :  { %v215_v8 = vrot.slane %v214_v1, 1  ;;  %v251_v20 = vrot.slane %v250_v41, 1  ;;  %v287_v21 = vrot.slane %v286_v4, 1  ;;  %v357_v49 = vrot.slane %v356_v7, 2 }
  0x6f   :  { %v108_v16 = vadd.f32 %v107_v3, %v106_v29  ;;  %v144_v13 = vadd.f32 %v143_v9, %v142_v48  ;;  %v180_v50 = vadd.f32 %v179_v11, %v178_v34  ;;  %v322_v23 = vadd.f32 %v321_v12, %v320_v28  ;;  %v1991_v48 = vld [vmem:[%s2318_s2 + $0x2b0] sm:$0xff]  ;;  %v1996_v34 = vld [vmem:[%s2318_s2 + $0x2b8] sm:$0xff]  ;;  %v2011_v3 = vld [vmem:[%s2318_s2 + $0x2c0] sm:$0xff] }
  0x70   :  { %v216_v53 = vadd.f32 %v215_v8, %v214_v1  ;;  %v252_v54 = vadd.f32 %v251_v20, %v250_v41  ;;  %v288_v55 = vadd.f32 %v287_v21, %v286_v4  ;;  %v358_v56 = vadd.f32 %v357_v49, %v356_v7  ;;  %v2001_v1 = vld [vmem:[%s2318_s2 + $0x230] sm:$0xff]  ;;  %v2006_v28 = vld [vmem:[%s2318_s2 + $0x238] sm:$0xff]  ;;  %v2016_v41 = vld [vmem:[%s2318_s2 + $0x2c8] sm:$0xff] }
  0x71   :  { %v381_v57 = vsub.f32 %v108_v16, %v1898_v33  ;;  %v323_v58 = vrot.slane %v322_v23, 1  ;;  %v387_v59 = vsub.f32 %v144_v13, %v1902_v63  ;;  %v393_v62 = vsub.f32 %v180_v50, %v1905_v0  ;;  %v2021_v8 = vld [vmem:[%s2318_s2 + $0x240] sm:$0xff]  ;;  %v2026_v12 = vld [vmem:[%s2318_s2 + $0x248] sm:$0xff]  ;;  %v2031_v16 = vld [vmem:[%s2318_s2 + $0x2d0] sm:$0xff] }
  0x72   :  { %v399_v38 = vsub.f32 %v216_v53, %v1909_v47  ;;  %v359_v39 = vrot.slane %v358_v56, 1  ;;  %v405_v43 = vsub.f32 %v252_v54, %v1912_v2  ;;  %v411_v5 = vsub.f32 %v288_v55, %v1915_v22  ;;  %v2036_v20 = vld [vmem:[%s2318_s2 + $0x2d8] sm:$0xff]  ;;  %v2041_v21 = vld [vmem:[%s2318_s2 + $0x250] sm:$0xff]  ;;  %v2051_v54 = vld [vmem:[%s2318_s2 + $0x2e0] sm:$0xff] }
  0x73   :  { %v477_v52 = vrot.slane %v1898_v33, 7  ;;  %v324_v10 = vadd.f32 %v323_v58, %v322_v23  ;;  %v483_v60 = vrot.slane %v1902_v63, 7  ;;  %v489_v61 = vrot.slane %v1905_v0, 7  ;;  %v749_v63 = vld [vmem:[%s2318_s2 + $0x290] sm:$0xff]  ;;  %v2046_v49 = vld [vmem:[%s2318_s2 + $0x258] sm:$0xff] }
  0x74   :  { %v495_v14 = vrot.slane %v1909_v47, 7  ;;  %v360_v40 = vadd.f32 %v359_v39, %v358_v56  ;;  %v501_v15 = vrot.slane %v1912_v2, 7  ;;  %v507_v44 = vrot.slane %v1915_v22, 7  ;;  %v750_v2 = vld [vmem:[%s2318_s2 + $0x298] sm:$0xff]  ;;  %v733_v22 = vld [vmem:[%s2318_s2 + $0x210] sm:$0xff] }
  0x75   :  { %v513_v17 = vrot.slane %v1919_v6, 7  ;;  %v417_v45 = vsub.f32 %v324_v10, %v1919_v6  ;;  %v519_v18 = vrot.slane %v1922_v51, 7  ;;  %v573_v19 = vsub.f32 %v381_v57, %v477_v52  ;;  %v734_v6 = vld [vmem:[%s2318_s2 + $0x218] sm:$0xff]  ;;  %v2075_v10 = vld [vmem:[%s2318_s2 + $0x2f0] sm:$0xff] }
  0x76   :  { %v579_v33 = vsub.f32 %v387_v59, %v483_v60  ;;  %v423_v0 = vsub.f32 %v360_v40, %v1922_v51  ;;  %v585_v47 = vsub.f32 %v393_v62, %v489_v61  ;;  %v591_v31 = vsub.f32 %v399_v38, %v495_v14  ;;  %v751_v51 = vld [vmem:[%s2318_s2 + $0x2a0] sm:$0xff]  ;;  %v2057_v59 = vld [vmem:[%s2318_s2 + $0x2e8] sm:$0xff]  ;;  %v2080_v60 = vld [vmem:[%s2318_s2 + $0x2f8] sm:$0xff] }
  0x77   :  { %v597_v32 = vsub.f32 %v405_v43, %v501_v15  ;;  %v603_v24 = vsub.f32 %v411_v5, %v507_v44  ;;  %v609_v25 = vsub.f32 %v417_v45, %v513_v17  ;;  %v621_v35 = vmul.f32 0.16666667, %v573_v19  ;;  %v2062_v62 = vld [vmem:[%s2318_s2 + $0x260] sm:$0xff]  ;;  %v2067_v38 = vld [vmem:[%s2318_s2 + $0x268] sm:$0xff]  ;;  %v2085_v61 = vld [vmem:[%s2318_s2 + $0x270] sm:$0xff] }
  0x78   :  { %v627_v26 = vmul.f32 0.16666667, %v579_v33  ;;  %v615_v29 = vsub.f32 %v423_v0, %v519_v18  ;;  %v633_v42 = vmul.f32 0.16666667, %v585_v47  ;;  %v639_v30 = vmul.f32 0.16666667, %v591_v31 }
  0x79   :  { %v645_v46 = vmul.f32 0.16666667, %v597_v32  ;;  %v651_v4 = vmul.f32 0.16666667, %v603_v24  ;;  %v657_v7 = vmul.f32 0.16666667, %v609_v25  ;;  %v1339_v11 = vpack.c.bf16 %v750_v2, %v749_v63 }
  0x7a   :  { %v853_v9 = vrot.slane %v627_v26, 7  ;;  %v663_v13 = vmul.f32 0.16666667, %v615_v29  ;;  %v855_v50 = vrot.slane %v633_v42, 6  ;;  %v857_v53 = vrot.slane %v639_v30, 5  ;;  %v2097_v17 = vld [vmem:[%s2318_s2 + $0x278] sm:$0xff] }
  0x7b   :  { %v859_v23 = vrot.slane %v645_v46, 4  ;;  %v861_v56 = vrot.slane %v651_v4, 3  ;;  %v863_v57 = vrot.slane %v657_v7, 2  ;;  %1340 = vmatprep.subr.bf16.mxu0 %v1339_v11  ;;  %v1341_v58 = vpack.c.bf16 %v734_v6, %v733_v22  ;;  %v2102_v45 = vld [vmem:[%s2317_s1 + $0x10] sm:$0xff]  ;;  %v2107_v18 = vld [vmem:[%s2317_s1 + $0x28] sm:$0xff]  ;;  %v2119_v47 = vld [vmem:[%s2317_s1 + $0x40] sm:$0xff] }
  0x7c   :  { %v854_v55 = vsel %vm819_vm0, %v853_v9, %v621_v35  ;;  %v865_v43 = vrot.slane %v663_v13, 1  ;;  %v1343_v5 = vpack.c.bf16 %v752_v27, %v751_v51  ;;  %v1345_v52 = vpack.c.bf16 %v1986_v37, %v1981_v36  ;;  %v2124_v31 = vld [vmem:[%s2317_s1 + $0x58] sm:$0xff]  ;;  %v2129_v32 = vld [vmem:[%s2317_s1 + $0x70] sm:$0xff]  ;;  %v2141_v25 = vld [vmem:[%s2317_s1 + $0x88] sm:$0xff] }
  0x7d   :  { %v856_v39 = vsel %vm822_vm1, %v855_v50, %v854_v55  ;;  %1342 = vmatpush3.bf16.msra.mxu0 %v1341_v58  ;;  %v1347_v40 = vpack.c.bf16 %v1996_v34, %v1991_v48  ;;  %v1349_v15 = vpack.c.bf16 %v2006_v28, %v2001_v1  ;;  %v1351_v44 = vpack.c.bf16 %v2016_v41, %v2011_v3  ;;  %v2146_v35 = vld [vmem:[%s2317_s1 + $0xa0] sm:$0xff]  ;;  %v2151_v26 = vld [vmem:[%s2317_s1 + $0xb8] sm:$0xff] }
  0x7e   :  { %v858_v14 = vsel %vm825_vm2, %v857_v53, %v856_v39  ;;  %1344 = vmatprep.subr.bf16.mxu0 %v1343_v5  ;;  %v1353_v33 = vpack.c.bf16 %v2026_v12, %v2021_v8  ;;  %v1355_v63 = vpack.c.bf16 %v2036_v20, %v2031_v16  ;;  %v1357_v0 = vpack.c.bf16 %v2046_v49, %v2041_v21 }
  0x7f   :  { %v860_v19 = vsel %vm828_vm3, %v859_v23, %v858_v14  ;;  %v1359_v22 = vpack.c.bf16 %v2057_v59, %v2051_v54  ;;  %v1361_v6 = vpack.c.bf16 %v2067_v38, %v2062_v62  ;;  %v1363_v24 = vpack.c.bf16 %v2080_v60, %v2075_v10 }
  0x80   :  { %v862_v2 = vsel %vm831_vm4, %v861_v56, %v860_v19  ;;  %v1365_v27 = vpack.c.bf16 %v2097_v17, %v2085_v61  ;;  %v2157_v36 = vunpack.c.h.bf16 %v2102_v45  ;;  %v2160_v37 = vunpack.c.h.bf16 %v2107_v18 }
  0x81   :  { %v864_v51 = vsel %vm834_vm5, %v863_v57, %v862_v2  ;;  %1346 = vmatpush3.bf16.msra.mxu0 %v1345_v52  ;;  %v2164_v42 = vunpack.c.h.bf16 %v2119_v47  ;;  %v2167_v30 = vunpack.c.h.bf16 %v2124_v31  ;;  %v2170_v46 = vunpack.c.h.bf16 %v2129_v32 }
  0x82   :  { %v866_v29 = vsel %vm837_vm6, %v865_v43, %v864_v51  ;;  %1348 = vmatprep.subr.bf16.mxu0 %v1347_v40  ;;  %v2173_v48 = vunpack.c.h.bf16 %v2141_v25  ;;  %v2176_v34 = vunpack.c.h.bf16 %v2146_v35  ;;  %v2179_v1 = vunpack.c.h.bf16 %v2151_v26 }
  0x83   :  { %1050 = vmatmul.mubr.f32.vlgmr.msra.gmra.mrb[0].mxu1 %v866_v29  ;;  %v121_v28 = vrot.slane %v2157_v36, 4  ;;  %v157_v3 = vrot.slane %v2160_v37, 4  ;;  %v193_v41 = vrot.slane %v2164_v42, 4  ;;  %v229_v4 = vrot.slane %v2167_v30, 4 }
  0x84   :  { %v265_v7 = vrot.slane %v2170_v46, 4  ;;  %v301_v11 = vrot.slane %v2173_v48, 4  ;;  %v337_v8 = vrot.slane %v2176_v34, 4  ;;  %v373_v12 = vrot.slane %v2179_v1, 4 }
  0x85   :  { %v122_v9 = vadd.f32 %v121_v28, %v2157_v36  ;;  %1350 = vmatpush3.bf16.msra.mxu0 %v1349_v15  ;;  %v158_v16 = vadd.f32 %v157_v3, %v2160_v37  ;;  %v194_v20 = vadd.f32 %v193_v41, %v2164_v42  ;;  %v230_v13 = vadd.f32 %v229_v4, %v2167_v30 }
  0x86   :  { %v266_v50 = vadd.f32 %v265_v7, %v2170_v46  ;;  %1352 = vmatprep.subr.bf16.mxu0 %v1351_v44  ;;  %v302_v23 = vadd.f32 %v301_v11, %v2173_v48  ;;  %v338_v55 = vadd.f32 %v337_v8, %v2176_v34  ;;  %v374_v56 = vadd.f32 %v373_v12, %v2179_v1 }
  0x87   :  { %v123_v53 = vrot.slane %v122_v9, 2  ;;  %v159_v57 = vrot.slane %v158_v16, 2  ;;  %v195_v58 = vrot.slane %v194_v20, 2  ;;  %v231_v39 = vrot.slane %v230_v13, 2 }
  0x88   :  { %v267_v43 = vrot.slane %v266_v50, 2  ;;  %v303_v52 = vrot.slane %v302_v23, 2  ;;  %v339_v14 = vrot.slane %v338_v55, 2  ;;  %v375_v40 = vrot.slane %v374_v56, 2 }
  0x89   :  { %v124_v5 = vadd.f32 %v123_v53, %v122_v9  ;;  %1354 = vmatpush3.bf16.msra.mxu0 %v1353_v33  ;;  %v160_v15 = vadd.f32 %v159_v57, %v158_v16  ;;  %v196_v19 = vadd.f32 %v195_v58, %v194_v20  ;;  %v232_v2 = vadd.f32 %v231_v39, %v230_v13 }
  0x8a   :  { %v268_v44 = vadd.f32 %v267_v43, %v266_v50  ;;  %1356 = vmatprep.subr.bf16.mxu0 %v1355_v63  ;;  %v304_v29 = vadd.f32 %v303_v52, %v302_v23  ;;  %v340_v28 = vadd.f32 %v339_v14, %v338_v55  ;;  %v376_v3 = vadd.f32 %v375_v40, %v374_v56 }
  0x8b   :  { %v125_v51 = vrot.slane %v124_v5, 1  ;;  %v161_v41 = vrot.slane %v160_v15, 1  ;;  %v197_v4 = vrot.slane %v196_v19, 1  ;;  %v233_v7 = vrot.slane %v232_v2, 1 }
  0x8c   :  { %v269_v11 = vrot.slane %v268_v44, 1  ;;  %v305_v12 = vrot.slane %v304_v29, 1  ;;  %v341_v9 = vrot.slane %v340_v28, 1  ;;  %v377_v53 = vrot.slane %v376_v3, 1 }
  0x8d   :  { %v126_v8 = vadd.f32 %v125_v51, %v124_v5  ;;  %1358 = vmatpush3.bf16.msra.mxu0 %v1357_v0  ;;  %v162_v33 = vadd.f32 %v161_v41, %v160_v15  ;;  %v198_v16 = vadd.f32 %v197_v4, %v196_v19  ;;  %v234_v20 = vadd.f32 %v233_v7, %v232_v2 }
  0x8e   :  { %v270_v63 = vadd.f32 %v269_v11, %v268_v44  ;;  %1360 = vmatprep.subr.bf16.mxu0 %v1359_v22  ;;  %v306_v13 = vadd.f32 %v305_v12, %v304_v29  ;;  %v342_v50 = vadd.f32 %v341_v9, %v340_v28  ;;  %v378_v23 = vadd.f32 %v377_v53, %v376_v3 }
  0x8f   :  { %v384_v55 = vsub.f32 %v126_v8, %v2157_v36  ;;  %v390_v56 = vsub.f32 %v162_v33, %v2160_v37  ;;  %v396_v57 = vsub.f32 %v198_v16, %v2164_v42  ;;  %v402_v21 = vsub.f32 %v234_v20, %v2167_v30 }
  0x90   :  { %v408_v49 = vsub.f32 %v270_v63, %v2170_v46  ;;  %v414_v0 = vsub.f32 %v306_v13, %v2173_v48  ;;  %v420_v58 = vsub.f32 %v342_v50, %v2176_v34  ;;  %v426_v54 = vsub.f32 %v378_v23, %v2179_v1 }
  0x91   :  { %v480_v59 = vrot.slane %v2157_v36, 7  ;;  %1362 = vmatpush3.bf16.msra.mxu0 %v1361_v6  ;;  %v486_v22 = vrot.slane %v2160_v37, 7  ;;  %v492_v39 = vrot.slane %v2164_v42, 7  ;;  %v498_v43 = vrot.slane %v2167_v30, 7 }
  0x92   :  { %v504_v5 = vrot.slane %v2170_v46, 7  ;;  %1364 = vmatprep.subr.bf16.mxu0 %v1363_v24  ;;  %v510_v52 = vrot.slane %v2173_v48, 7  ;;  %v516_v36 = vrot.slane %v2176_v34, 7  ;;  %v522_v14 = vrot.slane %v2179_v1, 7 }
  0x93   :  { %v576_v62 = vsub.f32 %v384_v55, %v480_v59  ;;  %v582_v38 = vsub.f32 %v390_v56, %v486_v22  ;;  %v588_v6 = vsub.f32 %v396_v57, %v492_v39  ;;  %v594_v37 = vsub.f32 %v402_v21, %v498_v43 }
  0x94   :  { %v600_v40 = vsub.f32 %v408_v49, %v504_v5  ;;  %v606_v42 = vsub.f32 %v414_v0, %v510_v52  ;;  %v612_v15 = vsub.f32 %v420_v58, %v516_v36  ;;  %v618_v30 = vsub.f32 %v426_v54, %v522_v14 }
  0x95   :  { %v624_v19 = vmul.f32 0.16666667, %v576_v62  ;;  %1366 = vmatpush3.bf16.msra.mxu0 %v1365_v27  ;;  %v630_v10 = vmul.f32 0.16666667, %v582_v38  ;;  %v636_v60 = vmul.f32 0.16666667, %v588_v6  ;;  %v2229_v46 = vunpack.c.l.bf16 %v2102_v45 }
  0x96   :  { %v642_v24 = vmul.f32 0.16666667, %v594_v37  ;;  %v648_v48 = vmul.f32 0.16666667, %v600_v40  ;;  %v654_v34 = vmul.f32 0.16666667, %v606_v42  ;;  %v2232_v2 = vunpack.c.l.bf16 %v2107_v18 }
  0x97   :  { %v660_v1 = vmul.f32 0.16666667, %v612_v15  ;;  %v666_v44 = vmul.f32 0.16666667, %v618_v30  ;;  %v895_v51 = vrot.slane %v630_v10, 7  ;;  %v897_v29 = vrot.slane %v636_v60, 6 }
  0x98   :  { %v899_v28 = vrot.slane %v642_v24, 5  ;;  %v901_v3 = vrot.slane %v648_v48, 4  ;;  %v903_v41 = vrot.slane %v654_v34, 3  ;;  %v2235_v17 = vunpack.c.l.bf16 %v2119_v47 }
  0x99   :  { %v905_v61 = vrot.slane %v660_v1, 2  ;;  %v896_v27 = vsel %vm819_vm0, %v895_v51, %v624_v19  ;;  %v907_v45 = vrot.slane %v666_v44, 1  ;;  %v2239_v4 = vunpack.c.l.bf16 %v2124_v31 }
  0x9a   :  { %v2242_v7 = vunpack.c.l.bf16 %v2129_v32  ;;  %v898_v18 = vsel %vm822_vm1, %v897_v29, %v896_v27  ;;  %v2246_v11 = vunpack.c.l.bf16 %v2141_v25  ;;  %v2249_v8 = vunpack.c.l.bf16 %v2146_v35 }
  0x9b   :  { %v2252_v47 = vunpack.c.l.bf16 %v2151_v26  ;;  %v900_v12 = vsel %vm825_vm2, %v899_v28, %v898_v18  ;;  %v115_v9 = vrot.slane %v2229_v46, 4  ;;  %v151_v31 = vrot.slane %v2232_v2, 4 }
  0x9c   :  { %v187_v32 = vrot.slane %v2235_v17, 4  ;;  %v902_v53 = vsel %vm828_vm3, %v901_v3, %v900_v12  ;;  %v223_v33 = vrot.slane %v2239_v4, 4  ;;  %v259_v25 = vrot.slane %v2242_v7, 4 }
  0x9d   :  { %v295_v35 = vrot.slane %v2246_v11, 4  ;;  %v904_v16 = vsel %vm831_vm4, %v903_v41, %v902_v53  ;;  %v116_v26 = vadd.f32 %v115_v9, %v2229_v46  ;;  %v152_v20 = vadd.f32 %v151_v31, %v2232_v2 }
  0x9e   :  { %v188_v63 = vadd.f32 %v187_v32, %v2235_v17  ;;  %v906_v13 = vsel %vm834_vm5, %v905_v61, %v904_v16  ;;  %v224_v50 = vadd.f32 %v223_v33, %v2239_v4  ;;  %v260_v23 = vadd.f32 %v259_v25, %v2242_v7 }
  0x9f   :  { %v296_v55 = vadd.f32 %v295_v35, %v2246_v11  ;;  %v908_v56 = vsel %vm837_vm6, %v907_v45, %v906_v13  ;;  %v117_v57 = vrot.slane %v116_v26, 2  ;;  %v153_v21 = vrot.slane %v152_v20, 2 }
  0xa0   :  { %v189_v49 = vrot.slane %v188_v63, 2  ;;  %1119 = vmatprep.mubr.f32.mxu0 %v908_v56  ;;  %v225_v0 = vrot.slane %v224_v50, 2  ;;  %v261_v58 = vrot.slane %v260_v23, 2  ;;  %v331_v59 = vrot.slane %v2249_v8, 4 }
  0xa1   :  { %v297_v54 = vrot.slane %v296_v55, 2  ;;  %v118_v22 = vadd.f32 %v117_v57, %v116_v26  ;;  %v154_v39 = vadd.f32 %v153_v21, %v152_v20  ;;  %v367_v5 = vrot.slane %v2252_v47, 4 }
  0xa2   :  { %v190_v43 = vadd.f32 %v189_v49, %v188_v63  ;;  %v226_v52 = vadd.f32 %v225_v0, %v224_v50  ;;  %v262_v36 = vadd.f32 %v261_v58, %v260_v23  ;;  %v332_v62 = vadd.f32 %v331_v59, %v2249_v8 }
  0xa3   :  { %v298_v14 = vadd.f32 %v297_v54, %v296_v55  ;;  %v119_v38 = vrot.slane %v118_v22, 1  ;;  %v155_v6 = vrot.slane %v154_v39, 1  ;;  %v368_v40 = vadd.f32 %v367_v5, %v2252_v47 }
  0xa4   :  { %v191_v37 = vrot.slane %v190_v43, 1  ;;  %v227_v42 = vrot.slane %v226_v52, 1  ;;  %v263_v15 = vrot.slane %v262_v36, 1  ;;  %v333_v19 = vrot.slane %v332_v62, 2 }
  0xa5   :  { %v299_v30 = vrot.slane %v298_v14, 1  ;;  %v120_v10 = vadd.f32 %v119_v38, %v118_v22  ;;  %v156_v60 = vadd.f32 %v155_v6, %v154_v39  ;;  %v369_v48 = vrot.slane %v368_v40, 2 }
  0xa6   :  { %v192_v24 = vadd.f32 %v191_v37, %v190_v43  ;;  %v228_v34 = vadd.f32 %v227_v42, %v226_v52  ;;  %v264_v1 = vadd.f32 %v263_v15, %v262_v36  ;;  %v334_v51 = vadd.f32 %v333_v19, %v332_v62 }
  0xa7   :  { %v300_v44 = vadd.f32 %v299_v30, %v298_v14  ;;  %v370_v29 = vadd.f32 %v369_v48, %v368_v40  ;;  %v383_v28 = vsub.f32 %v120_v10, %v2229_v46  ;;  %v389_v3 = vsub.f32 %v156_v60, %v2232_v2  ;;  %v1165_v30 = vld [vmem:[%s2319_s3] ss:$0 sm:$0xff]  ;;  %s1392_s3 = smov [#allocation3]  }
  0xa8   :  { %v395_v41 = vsub.f32 %v192_v24, %v2235_v17  ;;  %v335_v61 = vrot.slane %v334_v51, 1  ;;  %v401_v27 = vsub.f32 %v228_v34, %v2239_v4  ;;  %v407_v45 = vsub.f32 %v264_v1, %v2242_v7  ;;  %s1157_s24 = sshll.u32 %s1392_s3, 4  ;;  %s1158_s24 = int_to_ptr.vmem [resolvable:$true] %s1157_s24 }
  0xa9   :  { %v413_v18 = vsub.f32 %v300_v44, %v2246_v11  ;;  %v371_v12 = vrot.slane %v370_v29, 1  ;;  %v479_v9 = vrot.slane %v2229_v46, 7  ;;  %v485_v31 = vrot.slane %v2232_v2, 7  ;;  %s1368_s0 = scalar_lea.vmem %s1158_s24, 128  ;;  %p1373_p1 = scmp.lt.s32.totalorder %s1158_s24, %s1158_s24 }
  0xaa   :  { %v491_v32 = vrot.slane %v2235_v17, 7  ;;  %v336_v53 = vadd.f32 %v335_v61, %v334_v51  ;;  %v497_v33 = vrot.slane %v2239_v4, 7  ;;  %v503_v25 = vrot.slane %v2242_v7, 7  ;;  %p1369_p0 = scmp.ne.s32.totalorder %s1158_s24, %s1368_s0  ;;  %p1374_p2 = scmp.lt.s32.totalorder %s1368_s0, %s1368_s0 }
  0xab   :  { %v509_v35 = vrot.slane %v2246_v11, 7  ;;  %v372_v16 = vadd.f32 %v371_v12, %v370_v29  ;;  %v515_v26 = vrot.slane %v2249_v8, 7  ;;  %v521_v20 = vrot.slane %v2252_v47, 7 }
  0xac   :  { %v575_v63 = vsub.f32 %v383_v28, %v479_v9  ;;  %v419_v13 = vsub.f32 %v336_v53, %v2249_v8  ;;  %v581_v46 = vsub.f32 %v389_v3, %v485_v31  ;;  %v587_v50 = vsub.f32 %v395_v41, %v491_v32  ;;  %p1375_p3 = por %p1374_p2, %p1373_p1 }
  0xad   :  { %v593_v2 = vsub.f32 %v401_v27, %v497_v33  ;;  %v425_v17 = vsub.f32 %v372_v16, %v2252_v47  ;;  %v599_v23 = vsub.f32 %v407_v45, %v503_v25  ;;  %v605_v55 = vsub.f32 %v413_v18, %v509_v35 }
  0xae   :  { %v623_v4 = vmul.f32 0.16666667, %v575_v63  ;;  %v611_v56 = vsub.f32 %v419_v13, %v515_v26  ;;  %v629_v7 = vmul.f32 0.16666667, %v581_v46  ;;  %v635_v57 = vmul.f32 0.16666667, %v587_v50  ;;  %p1376_p4 = pnand %p1375_p3, %p1369_p0 }
  0xaf   :  { %v641_v11 = vmul.f32 0.16666667, %v593_v2  ;;  %v617_v21 = vsub.f32 %v425_v17, %v521_v20  ;;  %v647_v49 = vmul.f32 0.16666667, %v599_v23  ;;  %v653_v0 = vmul.f32 0.16666667, %v605_v55 }
  0xb0   :  { %v659_v58 = vmul.f32 0.16666667, %v611_v56  ;;  %v881_v54 = vrot.slane %v629_v7, 7  ;;  %v883_v59 = vrot.slane %v635_v57, 6  ;;  %v1125_v34 = vlaneseq }
  0xb1   :  { %v885_v22 = vrot.slane %v641_v11, 5  ;;  %v665_v8 = vmul.f32 0.16666667, %v617_v21  ;;  %v887_v39 = vrot.slane %v647_v49, 4  ;;  %v889_v5 = vrot.slane %v653_v0, 3 }
  0xb2   :  { %v882_v43 = vsel %vm819_vm0, %v881_v54, %v623_v4  ;;  %v891_v52 = vrot.slane %v659_v58, 2  ;;  %v1126_v1 = vshrl.u32 %v1125_v34, 7  ;;  %v1128_v44 = vand.u32 127, %v1125_v34 }
  0xb3   :  { %v884_v47 = vsel %vm822_vm1, %v883_v59, %v882_v43  ;;  %v893_v14 = vrot.slane %v665_v8, 1  ;;  %v1136_v28 = vstv %s1135_s23 }
  0xb4   :  { %v886_v36 = vsel %vm825_vm2, %v885_v22, %v884_v47  ;;  %v1131_v51 = vmul.u32 128, %v1126_v1 }
  0xb5   :  { %v888_v62 = vsel %vm828_vm3, %v887_v39, %v886_v36 }
  0xb6   :  { %v890_v38 = vsel %vm831_vm4, %v889_v5, %v888_v62  ;;  %v1132_v29 = vadd.s32 %v1131_v51, %v1128_v44 }
  0xb7   :  { %v892_v6 = vsel %vm834_vm5, %v891_v52, %v890_v38 }
  0xb8   :  { %v894_v37 = vsel %vm837_vm6, %v893_v14, %v892_v6  ;;  %v1137_v3 = vxor.u32 %v1136_v28, %v1132_v29 }
  0xb9   :  { %1120 = vmatmul.mubr.f32.vlgmr.msra.gmra.mrb[2].mxu0 %v894_v37 }
  0xba   :  { %v1138_v41 = vshrl.u32 %v1137_v3, 16 }
  0xbc   :  { %v1139_v61 = vxor.u32 %v1138_v41, %v1137_v3 }
  0xbe   :  { %v1140_v27 = vmul.u32 2146121005, %v1139_v61 }
  0xc0   :  { %v1141_v45 = vshrl.u32 %v1140_v27, 15 }
  0xc2   :  { %v1142_v18 = vxor.u32 %v1141_v45, %v1140_v27 }
  0xc4   :  { %v1143_v12 = vmul.u32 2221713035, %v1142_v18 }
  0xc6   :  { %v1144_v9 = vshrl.u32 %v1143_v12, 16 }
  0xc8   :  { %v1145_v31 = vxor.u32 %v1144_v9, %v1143_v12 }
  0xca   :  { %v1146_v33 = vand.u32 16777215, %v1145_v31 }
  0xcc   :  { %vm1147_vm7 = vcmp.ge.u32.totalorder %v1146_v33, 1677721 }
 0x122   :  { %v1198_v40 = vpop.f32.mrb[0].mxu0 }
 0x123   :  { %v1199_v42 = vpop.f32.mrb[1].mxu0 }
 0x124   :  { %v1200_v15 = vadd.f32 %v1199_v42, %v1198_v40 }
 0x126   :  { %v982_v19 = vadd.f32 %v1200_v15, %v1165_v30 }
 0x156   :  { %v1233_v10 = vpop.f32.mrb[0].mxu1 }
 0x157   :  { %v1234_v60 = vpop.f32.mrb[1].mxu1 }
 0x158   :  { %v1235_v24 = vadd.f32 %v1234_v60, %v1233_v10 }
 0x15a   :  { %v1052_v48 = vadd.f32 %v1235_v24, %v982_v19 }
 0x18c   :  { %v1268_v32 = vpop.f32.mrb[2].mxu0 }
 0x18d   :  { %v1269_v53 = vpop.f32.mrb[3].mxu0 }
 0x18e   :  { %v1270_v25 = vadd.f32 %v1269_v53, %v1268_v32 }
 0x190   :  { %v1122_v35 = vadd.f32 %v1270_v25, %v1052_v48 }
 0x192   :  { %v1148_v16 = vmul.f32 1.1111112, %v1122_v35 }
 0x194   :  { %v1149_v26 = vsel %vm1147_vm7, %v1148_v16, 0.0 }
 0x195   :  { %1150 = vst [vmem:[#allocation3] sm:$0xff] %v1149_v26 }
 0x196   :  { %1379 = shalt.err (!%p1376_p4)
}
 0x197   :  { %s1380_s27 = scalar_lea.hbm %s2320_s4, 128 }
 0x198   :  { %p1381_p5 = scmp.ne.s32.totalorder %s2320_s4, %s1380_s27  ;;  %p1384_p6 = scmp.lt.u32.totalorder %s1380_s27, %s2320_s4 }
 0x19a   :  { %p1386_p7 = pnand %p1384_p6, %p1381_p5 }
 0x19c   :  { %1389 = shalt.err (!%p1386_p7)
}
 0x19d   :  { %1160 = dma.vmem_to_hbm [thread:$0]  %s1158_s24, 128, %s2320_s4, [#allocation4]  }
 0x19e   :  { %1390 = dma.done.wait [#allocation4], 128  }
 0x19f   :  { %1391 = vsyncadd [#allocation4], 4294967168 }
 0x1a0   :  { %1164 = vsyncpa [#allocation4], 1 }

</bundles_post_ra>
